<compile_context>
chip_gen: v6e
topology: v6e:2x2x1
jax: 0.10.0
libtpu: 0.0.40
codegen_flags: <defaults>
</compile_context>

<pallas_src>
import functools

import jax
import jax.numpy as jnp
from jax.experimental import pallas as pl
from jax.experimental.pallas import tpu as pltpu

SCALE_FACTOR = 0.18215  # LDM get_first_stage_encoding scale


# --------------------------------------------------------------------------
# Single fused Pallas kernel
# --------------------------------------------------------------------------
def _make_fused_kernel(rate, mode):
    """Final combine: out = w_tex * loss_textural + w_sem * loss_semantic."""
    if mode == 0:
        w_tex, w_sem = 0.0, -1.0      # torch reference returns -loss_semantic
    elif mode == 1:
        w_tex, w_sem = 1.0, 0.0
    else:  # mode == 2 (fused)
        w_tex, w_sem = 1.0, -float(rate)

    def kernel(px_ref, py_ref, w_stack_ref, b_stack_ref, noise_adj_ref, o_ref):
        # ---- one stacked MXU pass per image (bf16 in, f32 accumulate) ----
        # rows 0-3: scaled latent z^T, rows 4-7: W_den @ z^T (pre-conditioning)
        zx8 = jnp.dot(w_stack_ref[...], px_ref[...],
                      preferred_element_type=jnp.float32) + b_stack_ref[...]
        zy8 = jnp.dot(w_stack_ref[...], py_ref[...],
                      preferred_element_type=jnp.float32) + b_stack_ref[...]

        # ---- 8-sublane residual: rows 0-3 textural diff, 4-7 semantic ----
        # (conditioning already folded into noise_adj = noise - c)
        r = jnp.concatenate(
            [zx8[:4, :] - zy8[:4, :],
             zx8[4:, :] - noise_adj_ref[...]], axis=0)        # (8, M)
        sq = r * r                                            # one full-vreg mul

        M = px_ref.shape[1]
        inv = 1.0 / float(4 * M)
        loss_textural = jnp.sum(sq[:4, :]) * inv
        loss_semantic = jnp.sum(sq[4:, :]) * inv

        # ---- final scalar combine, written straight to SMEM ----
        o_ref[0, 0] = w_tex * loss_textural + w_sem * loss_semantic

    return kernel


# --------------------------------------------------------------------------
# Glue: transposed im2col patchify (2x2, stride 2) for NCHW input
# --------------------------------------------------------------------------
def patchify_T_nchw(x):
    """Return patches transposed as (C*4, N*H/2*W/2): the big patch axis is the
    last (lane) dim so the in-kernel matmul / reductions are lane-dense."""
    N, C, H, W = x.shape
    x = x.reshape(N, C, H // 2, 2, W // 2, 2)
    x = jnp.transpose(x, (1, 3, 5, 0, 2, 4))  # (C, kh, kw, N, H/2, W/2)
    return x.reshape(C * 4, N * (H // 2) * (W // 2))


# --------------------------------------------------------------------------
# target_model forward (synthetic SDM parameters) — one pallas_call total
# --------------------------------------------------------------------------
def target_model_forward(x, target_info, params, mode=2, rate=10000.0,
                         input_size=16):
    # TODO(synk): torch RandomCrop randomness not reproduced; target_size equals
    # the input spatial size, so pre_process(x) is the identity and the semantic
    # loss reuses the latent of x (no third encode).
    px = patchify_T_nchw(x)             # (K, M)
    py = patchify_T_nchw(target_info)   # (K, M)
    K, M = px.shape

    # ---- param-only algebra hoisted out of the kernel --------------------
    w_enc_s = SCALE_FACTOR * params["wt_enc"]                 # (4, K)
    b_enc_s = SCALE_FACTOR * params["bt_enc"]                 # (4, 1)
    w_den = params["wt_denoise"]                              # (4, 4)
    w_stack = jnp.concatenate([w_enc_s, w_den @ w_enc_s], axis=0)   # (8, K)
    b_stack = jnp.concatenate([b_enc_s, w_den @ b_enc_s], axis=0)   # (8, 1)
    # learned conditioning depends only on params: fold into the noise target
    ct = jnp.mean(params["wt_cond"] @ params["cond_emb_t"],
                  axis=1, keepdims=True)                      # (4, 1)
    noise_adj = params["noise_t"] - ct                        # (4, M)

    # Pad the (tiny, channel-derived) contraction dim to a bf16-friendly
    # multiple of 16; zero columns/rows contribute nothing to the matmul.
    K_pad = ((K + 15) // 16) * 16
    if K_pad != K:
        px = jnp.pad(px, ((0, K_pad - K), (0, 0)))
        py = jnp.pad(py, ((0, K_pad - K), (0, 0)))
        w_stack = jnp.pad(w_stack, ((0, 0), (0, K_pad - K)))

    # bf16 MXU inputs (f32 accumulation); loss math stays f32.
    px_bf = px.astype(jnp.bfloat16)
    py_bf = py.astype(jnp.bfloat16)
    w_stack_bf = w_stack.astype(jnp.bfloat16)

    kernel = _make_fused_kernel(rate, mode)
    flops = 2 * 2 * 8 * K_pad * M + 6 * 8 * M
    bytes_accessed = (2 * (px_bf.size + py_bf.size + w_stack_bf.size)
                      + 4 * (b_stack.size + noise_adj.size) + 4)

    loss = pl.pallas_call(
        kernel,
        out_shape=jax.ShapeDtypeStruct((1, 1), jnp.float32),
        in_specs=[pl.BlockSpec(memory_space=pltpu.MemorySpace.VMEM)] * 5,
        out_specs=pl.BlockSpec(memory_space=pltpu.MemorySpace.SMEM),
        cost_estimate=pl.CostEstimate(flops=flops, transcendentals=0,
                                      bytes_accessed=bytes_accessed),
    )(px_bf, py_bf, w_stack_bf, b_stack, noise_adj)
    return loss[0, 0]


# --------------------------------------------------------------------------
def make_params(key, N, C_in, H, W, C_lat=4, seq=8, hidden=32):
    k1, k2, k3, k4, k5, k6 = jax.random.split(key, 6)
    M = N * (H // 2) * (W // 2)
    return {
        # first-stage encoder: 2x2/stride-2 conv, stored transposed (C_lat, C_in*4)
        "wt_enc": 0.1 * jax.random.normal(k1, (C_lat, C_in * 4), jnp.float32),
        "bt_enc": 0.1 * jax.random.normal(k2, (C_lat, 1), jnp.float32),
        # simplified denoiser (1x1 conv over latent channels), transposed
        "wt_denoise": 0.1 * jax.random.normal(k3, (C_lat, C_lat), jnp.float32),
        # learned conditioning: fixed text embedding (hidden, seq) + projection^T
        "cond_emb_t": jax.random.normal(k4, (hidden, seq), jnp.float32),
        "wt_cond": 0.05 * jax.random.normal(k5, (C_lat, hidden), jnp.float32),
        # deterministic pseudo-noise target, transposed to (C_lat, M)
        "noise_t": jax.random.normal(k6, (C_lat, M), jnp.float32),
    }


if __name__ == "__main__":
    key = jax.random.PRNGKey(0)
    kx, ky, kp = jax.random.split(key, 3)

    N, C_in, H, W = 2, 3, 16, 16     # small NCHW image batch
    x = jax.random.normal(kx, (N, C_in, H, W), jnp.float32)
    target = jax.random.normal(ky, (N, C_in, H, W), jnp.float32)

    params = make_params(kp, N, C_in, H, W)

    fwd = jax.jit(functools.partial(target_model_forward, mode=2,
                                    rate=10000.0, input_size=H))
    loss = jax.block_until_ready(fwd(x, target, params))
    assert loss.shape == () and jnp.isfinite(loss)
    print("KERNEL_OK")
</pallas_src>

<mosaic_0001>
module attributes {stable_mosaic.version = 11 : i64} {
  func.func @kernel(%arg0: memref<16x128xbf16, #tpu.memory_space<vmem>>, %arg1: memref<16x128xbf16, #tpu.memory_space<vmem>>, %arg2: memref<8x16xbf16, #tpu.memory_space<vmem>>, %arg3: memref<8x1xf32, #tpu.memory_space<vmem>>, %arg4: memref<4x128xf32, #tpu.memory_space<vmem>>, %arg5: memref<1x1xf32, #tpu.memory_space<smem>>) attributes {dimension_semantics = [], scalar_prefetch = 0 : i64, scratch_operands = 0 : i64, tpu.core_type = #tpu.core_type<tc>} {
    %c0 = arith.constant 0 : index
    %c0_0 = arith.constant 0 : index
    %0 = vector.load %arg2[%c0, %c0_0] : memref<8x16xbf16, #tpu.memory_space<vmem>>, vector<8x16xbf16>
    %c0_1 = arith.constant 0 : index
    %c0_2 = arith.constant 0 : index
    %1 = vector.load %arg0[%c0_1, %c0_2] : memref<16x128xbf16, #tpu.memory_space<vmem>>, vector<16x128xbf16>
    %cst = arith.constant dense<0.000000e+00> : vector<8x128xf32>
    %2 = tpu.matmul %0, %1, %cst {dimension_numbers = #tpu.dot_dimension_numbers<[1], [0], [0], [1], [0, 0, 1, 1], [], []>} : vector<8x16xbf16>, vector<16x128xbf16>, vector<8x128xf32> -> vector<8x128xf32>
    %c0_3 = arith.constant 0 : index
    %c0_4 = arith.constant 0 : index
    %3 = vector.load %arg3[%c0_3, %c0_4] : memref<8x1xf32, #tpu.memory_space<vmem>>, vector<8x1xf32>
    %4 = vector.broadcast %3 : vector<8x1xf32> to vector<8x128xf32>
    %5 = arith.addf %2, %4 : vector<8x128xf32>
    %c0_5 = arith.constant 0 : index
    %c0_6 = arith.constant 0 : index
    %6 = vector.load %arg2[%c0_5, %c0_6] : memref<8x16xbf16, #tpu.memory_space<vmem>>, vector<8x16xbf16>
    %c0_7 = arith.constant 0 : index
    %c0_8 = arith.constant 0 : index
    %7 = vector.load %arg1[%c0_7, %c0_8] : memref<16x128xbf16, #tpu.memory_space<vmem>>, vector<16x128xbf16>
    %cst_9 = arith.constant dense<0.000000e+00> : vector<8x128xf32>
    %8 = tpu.matmul %6, %7, %cst_9 {dimension_numbers = #tpu.dot_dimension_numbers<[1], [0], [0], [1], [0, 0, 1, 1], [], []>} : vector<8x16xbf16>, vector<16x128xbf16>, vector<8x128xf32> -> vector<8x128xf32>
    %c0_10 = arith.constant 0 : index
    %c0_11 = arith.constant 0 : index
    %9 = vector.load %arg3[%c0_10, %c0_11] : memref<8x1xf32, #tpu.memory_space<vmem>>, vector<8x1xf32>
    %10 = vector.broadcast %9 : vector<8x1xf32> to vector<8x128xf32>
    %11 = arith.addf %8, %10 : vector<8x128xf32>
    %12 = vector.extract_strided_slice %5 {offsets = [0, 0], sizes = [4, 128], strides = [1, 1]} : vector<8x128xf32> to vector<4x128xf32>
    %13 = vector.extract_strided_slice %11 {offsets = [0, 0], sizes = [4, 128], strides = [1, 1]} : vector<8x128xf32> to vector<4x128xf32>
    %14 = arith.subf %12, %13 : vector<4x128xf32>
    %15 = vector.extract_strided_slice %5 {offsets = [4, 0], sizes = [4, 128], strides = [1, 1]} : vector<8x128xf32> to vector<4x128xf32>
    %c0_12 = arith.constant 0 : index
    %c0_13 = arith.constant 0 : index
    %16 = vector.load %arg4[%c0_12, %c0_13] : memref<4x128xf32, #tpu.memory_space<vmem>>, vector<4x128xf32>
    %17 = arith.subf %15, %16 : vector<4x128xf32>
    %18 = tpu.concatenate %14, %17 in 0 : vector<4x128xf32>, vector<4x128xf32> -> vector<8x128xf32>
    %19 = arith.mulf %18, %18 : vector<8x128xf32>
    %20 = vector.extract_strided_slice %19 {offsets = [0, 0], sizes = [4, 128], strides = [1, 1]} : vector<8x128xf32> to vector<4x128xf32>
    %21 = vector.shape_cast %20 : vector<4x128xf32> to vector<1x4x128xf32>
    %cst_14 = arith.constant dense<0.000000e+00> : vector<1xf32>
    %22 = vector.multi_reduction <add>, %21, %cst_14 [1, 2] : vector<1x4x128xf32> to vector<1xf32>
    %23 = vector.shape_cast %22 : vector<1xf32> to vector<1x1x1xf32>
    %24 = vector.extract %23[0, 0, 0] : f32 from vector<1x1x1xf32>
    %cst_15 = arith.constant 0.001953125 : f32
    %25 = arith.mulf %24, %cst_15 : f32
    %26 = vector.extract_strided_slice %19 {offsets = [4, 0], sizes = [4, 128], strides = [1, 1]} : vector<8x128xf32> to vector<4x128xf32>
    %27 = vector.shape_cast %26 : vector<4x128xf32> to vector<1x4x128xf32>
    %cst_16 = arith.constant dense<0.000000e+00> : vector<1xf32>
    %28 = vector.multi_reduction <add>, %27, %cst_16 [1, 2] : vector<1x4x128xf32> to vector<1xf32>
    %29 = vector.shape_cast %28 : vector<1xf32> to vector<1x1x1xf32>
    %30 = vector.extract %29[0, 0, 0] : f32 from vector<1x1x1xf32>
    %cst_17 = arith.constant 0.001953125 : f32
    %31 = arith.mulf %30, %cst_17 : f32
    %cst_18 = arith.constant 1.000000e+00 : f32
    %32 = arith.mulf %cst_18, %25 : f32
    %cst_19 = arith.constant -1.000000e+04 : f32
    %33 = arith.mulf %cst_19, %31 : f32
    %34 = arith.addf %32, %33 : f32
    %c0_20 = arith.constant 0 : index
    %c0_21 = arith.constant 0 : index
    %35 = memref.load %arg5[%c0_20, %c0_21] : memref<1x1xf32, #tpu.memory_space<smem>>
    memref.store %34, %arg5[%c0_20, %c0_21] : memref<1x1xf32, #tpu.memory_space<smem>>
    return
  }
}

</mosaic_0001>

<bundles_post_ra>
// kernel: target_model_forward.1
= control target key start
LH: loop header
LB: loop body
LE: loop exit
PB: predicated region body
PF: predicated region fallthrough
CT: control target
= control target key end

     0   :  { %v221_v1 = vmov 0.0   ;;  %vm222_vm0 = vmmov 0   ;;  %vm37_vm1 = vcmask 130048   ;;  %s273_s0 = inlined_call_operand.vmem [shape: bf16[16,128], index: 0, kind: input, shape index: {}]   ;;  %s274_s1 = inlined_call_operand.vmem [shape: bf16[16,128], index: 1, kind: input, shape index: {}]   ;;  %s275_s2 = inlined_call_operand.vmem [shape: bf16[8,16], index: 2, kind: input, shape index: {}]   ;;  %s276_s3 = inlined_call_operand.vmem [shape: f32[8,1], index: 3, kind: input, shape index: {}]   ;;  %s277_s4 = inlined_call_operand.vmem [shape: f32[4,128], index: 4, kind: input, shape index: {}]   ;;  %s278_s5 = inlined_call_operand.hbm [shape: f32[1,1], index: 5, kind: output, shape index: {}]  }
   0x1   :  { %v209_v0 = vld [vmem:[%s273_s0] sm:$0xff]   ;;  %188 = vmatprep.subr.bf16.mxu0 %v221_v1  ;;  %194 = vmatprep.subr.bf16.mxu1 %v221_v1 }
   0x2   :  { %v210_v2 = vld [vmem:[%s274_s1] sm:$0xff]   ;;  %189 = vmatpush3.bf16.msra.mxu0 %v209_v0  ;;  %190 = vmatprep.mubr.msk.bf16.mxu0 %vm222_vm0, %v221_v1 }
   0x3   :  { %v22_v3 = vld [vmem:[%s275_s2] sm:$0xf]  ;;  %195 = vmatpush3.bf16.msra.mxu1 %v210_v2  ;;  %196 = vmatprep.mubr.msk.bf16.mxu1 %vm222_vm0, %v221_v1 }
   0x4   :  { %v25_v4 = vld [vmem:[%s276_s3] sm:$0xff] }
   0x5   :  { %10 = vsyncpa [#allocation3], 0  ;;  %v223_v5 = vmov 0   ;;  %191 = vmatmul.mubr.msk.bf16.vlgmr.msra.gmra.mxu0 %vm37_vm1, %v22_v3  ;;  %v130_v6 = vld [vmem:[%s277_s4] sm:$0xf]  ;;  %vm135_vm2 = vcmask 1043456  }
   0x6   :  { %208 = vset.pattern.permute.xlu0 %v223_v5  ;;  %197 = vmatmul.mubr.msk.bf16.vlgmr.msra.gmra.mxu1 %vm37_vm1, %v22_v3  ;;  %v132_v8 = vrot.slane %v130_v6, 4  ;;  %s224_s29 = smov [#allocation2]  }
   0x7   :  { %28 = vperm.xlu0 %208, %v25_v4  }
  0x82   :  { %v29_v7 = vpop.permute.xlu0 %28 }
  0xc5   :  { %v75_v9 = vpop.f32.mrf.mxu0 }
  0xc6   :  { %v76_v10 = vadd.f32 %v75_v9, %v29_v7  ;;  %v123_v11 = vpop.f32.mrf.mxu1 }
  0xc7   :  { %v124_v12 = vadd.f32 %v123_v11, %v29_v7  ;;  %v192_v13 = vpop.f32.mrf.mxu0 }
  0xc8   :  { %v134_v14 = vsub.f32 %v76_v10, %v132_v8  ;;  %v198_v15 = vpop.f32.mrf.mxu1 }
  0xc9   :  { %v129_v16 = vsub.f32 %v76_v10, %v124_v12  ;;  %v78_v17 = vpop.f32.mrf.mxu0 }
  0xca   :  { %v126_v18 = vpop.f32.mrf.mxu1 }
  0xcb   :  { %v193_v19 = vpop.f32.mrf.mxu0  ;;  %v136_v20 = vsel %vm135_vm2, %v129_v16, %v134_v14 }
  0xcc   :  { %v199_v21 = vpop.f32.mrf.mxu1  ;;  %v137_v22 = vmul.f32 %v136_v20, %v136_v20 }
  0xce   :  { %v138_v23 = vsel %vm135_vm2, %v137_v22, 0.0  ;;  %v150_v24 = vrot.slane %v137_v22, 4 }
  0xcf   :  { %139 = vadd.xlane.f32.xlu0 %v138_v23 }
  0xd0   :  { %v152_v25 = vsel %vm135_vm2, %v150_v24, 0.0 }
  0xd1   :  { %153 = vadd.xlane.f32.xlu1 %v152_v25 }
 0x158   :  { %v140_v26 = vpop.xlane.xlu0 %139 }
 0x159   :  { %v141_v27 = vrot.slane %v140_v26, 4 }
 0x15a   :  { %v154_v28 = vpop.xlane.xlu1 %153 }
 0x15b   :  { %v142_v29 = vadd.f32 %v141_v27, %v140_v26  ;;  %v155_v30 = vrot.slane %v154_v28, 4 }
 0x15d   :  { %v143_v31 = vrot.slane %v142_v29, 2  ;;  %v156_v32 = vadd.f32 %v155_v30, %v154_v28 }
 0x15f   :  { %v157_v33 = vrot.slane %v156_v32, 2  ;;  %v144_v34 = vadd.f32 %v143_v31, %v142_v29 }
 0x161   :  { %v158_v35 = vadd.f32 %v157_v33, %v156_v32  ;;  %v145_v36 = vrot.slane %v144_v34, 1 }
 0x163   :  { %v146_v37 = vadd.f32 %v145_v36, %v144_v34  ;;  %v159_v38 = vrot.slane %v158_v35, 1 }
 0x165   :  { %200 = vpush %v146_v37  ;;  %v160_v39 = vadd.f32 %v159_v38, %v158_v35 }
 0x167   :  { %202 = vpush %v160_v39 }
 0x196   :  { %s201_s2 = spop %200 }
 0x197   :  { %s148_s26 = smul.f32 0.001953125, %s201_s2 }
 0x198   :  { %s203_s3 = spop %202 }
 0x199   :  { %s162_s4 = smul.f32 0.001953125, %s203_s3 }
 0x19b   :  { %s163_s27 = smul.f32 -10000.0, %s162_s4 }
 0x19d   :  { %s164_s28 = sadd.f32 %s163_s27, %s148_s26 }
 0x19f   :  { %166 = sst [smem:[#allocation2]] %s164_s28 }
 0x1a0   :  { %174 = dma.smem_to_hbm %s224_s29, 16, %s278_s5, [#allocation3]  }
 0x1a1   :  { %219 = dma.done.wait [#allocation3], 16  }
 0x1a2   :  { %220 = vsyncadd [#allocation3], 4294967280 }
 0x1a3   :  { %178 = sfence }
 0x1a4   :  { %179 = vsyncpa [#allocation3], 1 }

</bundles_post_ra>
